<compile_context>
chip_gen: v7x
topology: tpu7x:2x2x1
jax: 0.10.0
libtpu: 0.0.40
codegen_flags: <defaults>
</compile_context>

<pallas_src>
import functools

import jax
import jax.numpy as jnp
from jax.experimental import pallas as pl
from jax.experimental.pallas import tpu as pltpu


def _mlp_kernel(params_ref, x_ref, o_ref, *, hidden):
    """params_ref: SMEM (H*D + 2H + 1,) f32 packed [w1(H,D) | b1(H) | w2(H) | b2].
    x_ref: VMEM (D, R, 128) f32 — batch packed into (sublane, lane).
    o_ref: VMEM (R, 128) f32."""
    D = x_ref.shape[0]
    H = hidden
    w1_off = 0
    b1_off = H * D
    w2_off = b1_off + H
    b2_off = w2_off + H

    # Hoist x feature-rows: one full (R, 128) slab per input feature,
    # loaded once and reused across the unrolled MAC loop.
    x_rows = [x_ref[d] for d in range(D)]

    # Layer-2 accumulator (pre-activation z), seeded with b2.
    acc = jnp.full(o_ref.shape, params_ref[b2_off], dtype=jnp.float32)

    # Fully unrolled VPU broadcast-MACs: H*D mul-adds + H relu + H mul-adds.
    for j in range(H):
        hj = jnp.full(o_ref.shape, params_ref[b1_off + j], dtype=jnp.float32)
        for d in range(D):
            hj = hj + params_ref[w1_off + j * D + d] * x_rows[d]
        hj = jnp.maximum(hj, 0.0)                       # ReLU
        acc = acc + params_ref[w2_off + j] * hj

    # Stable, accurate sigmoid via a single EUP tanh: sigmoid(z) = 0.5*tanh(z/2)+0.5
    o_ref[...] = 0.5 * jnp.tanh(0.5 * acc) + 0.5


def _round_up(a, m):
    return ((a + m - 1) // m) * m


def logic_gate_forward(x, w1, b1, w2, b2, *, tile_rows=512):
    """Forward pass of LogicGateModel.

    x:  (B, D) float32
    w1: (H, D) float32   (PyTorch nn.Linear weight layout, H=4)
    b1: (H,)   float32
    w2: (O, H) float32   (O=1)
    b2: (O,)   float32
    returns (B, O) float32.

    tile_rows: sublane rows per batch tile (each row = 128 batch elements).
    Default 512 -> 64K elements / ~1.5 MiB double-buffered VMEM per step,
    comfortably under the scoped VMEM defaults of v5e(16MiB)/v6e(32MiB)/
    v7x(32MiB). Raise (and bump vmem_limit_bytes) only for very large B.
    """
    x = x.astype(jnp.float32)
    B, D = x.shape
    H = w1.shape[0]
    C = 128  # lane width

    # Pack all parameters into one small scalar array (lives in SMEM).
    params = jnp.concatenate([
        w1.reshape(-1), b1.reshape(-1), w2.reshape(-1), b2.reshape(-1),
    ]).astype(jnp.float32)

    # Batch packed into (sublane-rows, 128 lanes); rows padded to a multiple
    # of 8 (vreg sublanes) and of the tile size.
    rows_needed = pl.cdiv(B, C)
    tr = min(tile_rows, _round_up(rows_needed, 8))
    tr = _round_up(tr, 8)
    n_tiles = pl.cdiv(rows_needed, tr)
    rows_total = n_tiles * tr
    Bp = rows_total * C

    xT = x.T                                            # (D, B) feature-major
    if Bp != B:
        xT = jnp.pad(xT, ((0, 0), (0, Bp - B)))          # padded lanes sliced off below
    x_packed = xT.reshape(D, rows_total, C)              # free (row-major) reshape

    elems = float(Bp)
    cost = pl.CostEstimate(
        flops=int(elems * (2 * H * D + 3 * H + 4)),
        transcendentals=int(elems),
        bytes_accessed=int(elems * (D + 1) * 4),
    )

    y_packed = pl.pallas_call(
        functools.partial(_mlp_kernel, hidden=H),
        out_shape=jax.ShapeDtypeStruct((rows_total, C), jnp.float32),
        grid=(n_tiles,),
        in_specs=[
            # Packed params: single scalar-memory input, no per-step VMEM tile.
            pl.BlockSpec(memory_space=pltpu.MemorySpace.SMEM),
            # x tile: (D, tr, 128) — full (8,128)-aligned slab per feature.
            pl.BlockSpec((D, tr, C), lambda i: (0, i, 0)),
        ],
        out_specs=pl.BlockSpec((tr, C), lambda i: (i, 0)),  # lane+sublane dense store
        compiler_params=pltpu.CompilerParams(
            # Batch tiles are independent -> megacore-shardable on v7x.
            dimension_semantics=("parallel",),
        ),
        cost_estimate=cost,
    )(params, x_packed)

    # Free reshape + small slice back to (B, 1). Never reduce over padding.
    return y_packed.reshape(-1)[:B].reshape(B, 1)


def _reference(x, w1, b1, w2, b2):
    h = jnp.maximum(x @ w1.T + b1, 0.0)
    return jax.nn.sigmoid(h @ w2.T + b2)


if __name__ == "__main__":
    key = jax.random.PRNGKey(0)
    kx, k1, k2, k3, k4, kx2 = jax.random.split(key, 6)

    input_dim = 2          # logic-gate model: 2 binary inputs
    hidden = 4

    # PyTorch nn.Linear-style init bounds (weights in PyTorch (out, in) layout).
    bound1 = 1.0 / jnp.sqrt(jnp.float32(input_dim))
    bound2 = 1.0 / jnp.sqrt(jnp.float32(hidden))
    w1 = jax.random.uniform(k1, (hidden, input_dim), jnp.float32, -bound1, bound1)
    b1 = jax.random.uniform(k2, (hidden,), jnp.float32, -bound1, bound1)
    w2 = jax.random.uniform(k3, (1, hidden), jnp.float32, -bound2, bound2)
    b2 = jax.random.uniform(k4, (1,), jnp.float32, -bound2, bound2)

    # Case 1: B a multiple of 128 — all 2-bit combos tiled, with small noise.
    batch = 256
    base = jnp.array([[0, 0], [0, 1], [1, 0], [1, 1]], dtype=jnp.float32)
    x = jnp.tile(base, (batch // 4, 1))
    x = x + 0.01 * jax.random.normal(kx, x.shape, jnp.float32)

    out = jax.block_until_ready(logic_gate_forward(x, w1, b1, w2, b2))
    ref = _reference(x, w1, b1, w2, b2)
    assert out.shape == (batch, 1)
    assert jnp.allclose(out, ref, atol=1e-4), float(jnp.max(jnp.abs(out - ref)))

    # Case 2: ragged batch (B % 128 != 0) — exercises the padding/slice path.
    batch2 = 300
    x2 = jax.random.uniform(kx2, (batch2, input_dim), jnp.float32, 0.0, 1.0)
    out2 = jax.block_until_ready(logic_gate_forward(x2, w1, b1, w2, b2))
    ref2 = _reference(x2, w1, b1, w2, b2)
    assert out2.shape == (batch2, 1)
    assert jnp.allclose(out2, ref2, atol=1e-4), float(jnp.max(jnp.abs(out2 - ref2)))
    assert bool(jnp.all(jnp.isfinite(out2)))

    print("KERNEL_OK")
</pallas_src>

<mosaic_0001>
module attributes {stable_mosaic.version = 11 : i64} {
  func.func @_mlp_kernel(%arg0: i32, %arg1: memref<17xf32, #tpu.memory_space<smem>>, %arg2: memref<2x8x128xf32, #tpu.memory_space<vmem>>, %arg3: memref<8x128xf32, #tpu.memory_space<vmem>>) attributes {dimension_semantics = [#tpu.dimension_semantics<parallel>], iteration_bounds = array<i64: 1>, scalar_prefetch = 0 : i64, scratch_operands = 0 : i64, tpu.core_type = #tpu.core_type<tc>, window_params = [{transform_indices = @transform_0, window_bounds = array<i64: 17>}, {transform_indices = @transform_1, window_bounds = array<i64: 2, 8, 128>}, {transform_indices = @transform_2, window_bounds = array<i64: 8, 128>}]} {
    %c0 = arith.constant 0 : index
    %c0_0 = arith.constant 0 : index
    %c0_1 = arith.constant 0 : index
    %0 = vector.load %arg2[%c0, %c0_0, %c0_1] : memref<2x8x128xf32, #tpu.memory_space<vmem>>, vector<1x8x128xf32>
    %1 = vector.shape_cast %0 : vector<1x8x128xf32> to vector<8x128xf32>
    %c1 = arith.constant 1 : index
    %c0_2 = arith.constant 0 : index
    %c0_3 = arith.constant 0 : index
    %2 = vector.load %arg2[%c1, %c0_2, %c0_3] : memref<2x8x128xf32, #tpu.memory_space<vmem>>, vector<1x8x128xf32>
    %3 = vector.shape_cast %2 : vector<1x8x128xf32> to vector<8x128xf32>
    %c16 = arith.constant 16 : index
    %4 = memref.load %arg1[%c16] : memref<17xf32, #tpu.memory_space<smem>>
    %5 = vector.broadcast %4 : f32 to vector<8x128xf32>
    %c8 = arith.constant 8 : index
    %6 = memref.load %arg1[%c8] : memref<17xf32, #tpu.memory_space<smem>>
    %7 = vector.broadcast %6 : f32 to vector<8x128xf32>
    %c0_4 = arith.constant 0 : index
    %8 = memref.load %arg1[%c0_4] : memref<17xf32, #tpu.memory_space<smem>>
    %9 = vector.broadcast %8 : f32 to vector<8x128xf32>
    %10 = arith.mulf %9, %1 : vector<8x128xf32>
    %11 = arith.addf %7, %10 : vector<8x128xf32>
    %c1_5 = arith.constant 1 : index
    %12 = memref.load %arg1[%c1_5] : memref<17xf32, #tpu.memory_space<smem>>
    %13 = vector.broadcast %12 : f32 to vector<8x128xf32>
    %14 = arith.mulf %13, %3 : vector<8x128xf32>
    %15 = arith.addf %11, %14 : vector<8x128xf32>
    %cst = arith.constant 0.000000e+00 : f32
    %16 = vector.broadcast %cst : f32 to vector<8x128xf32>
    %17 = arith.maximumf %15, %16 : vector<8x128xf32>
    %c12 = arith.constant 12 : index
    %18 = memref.load %arg1[%c12] : memref<17xf32, #tpu.memory_space<smem>>
    %19 = vector.broadcast %18 : f32 to vector<8x128xf32>
    %20 = arith.mulf %19, %17 : vector<8x128xf32>
    %21 = arith.addf %5, %20 : vector<8x128xf32>
    %c9 = arith.constant 9 : index
    %22 = memref.load %arg1[%c9] : memref<17xf32, #tpu.memory_space<smem>>
    %23 = vector.broadcast %22 : f32 to vector<8x128xf32>
    %c2 = arith.constant 2 : index
    %24 = memref.load %arg1[%c2] : memref<17xf32, #tpu.memory_space<smem>>
    %25 = vector.broadcast %24 : f32 to vector<8x128xf32>
    %26 = arith.mulf %25, %1 : vector<8x128xf32>
    %27 = arith.addf %23, %26 : vector<8x128xf32>
    %c3 = arith.constant 3 : index
    %28 = memref.load %arg1[%c3] : memref<17xf32, #tpu.memory_space<smem>>
    %29 = vector.broadcast %28 : f32 to vector<8x128xf32>
    %30 = arith.mulf %29, %3 : vector<8x128xf32>
    %31 = arith.addf %27, %30 : vector<8x128xf32>
    %cst_6 = arith.constant 0.000000e+00 : f32
    %32 = vector.broadcast %cst_6 : f32 to vector<8x128xf32>
    %33 = arith.maximumf %31, %32 : vector<8x128xf32>
    %c13 = arith.constant 13 : index
    %34 = memref.load %arg1[%c13] : memref<17xf32, #tpu.memory_space<smem>>
    %35 = vector.broadcast %34 : f32 to vector<8x128xf32>
    %36 = arith.mulf %35, %33 : vector<8x128xf32>
    %37 = arith.addf %21, %36 : vector<8x128xf32>
    %c10 = arith.constant 10 : index
    %38 = memref.load %arg1[%c10] : memref<17xf32, #tpu.memory_space<smem>>
    %39 = vector.broadcast %38 : f32 to vector<8x128xf32>
    %c4 = arith.constant 4 : index
    %40 = memref.load %arg1[%c4] : memref<17xf32, #tpu.memory_space<smem>>
    %41 = vector.broadcast %40 : f32 to vector<8x128xf32>
    %42 = arith.mulf %41, %1 : vector<8x128xf32>
    %43 = arith.addf %39, %42 : vector<8x128xf32>
    %c5 = arith.constant 5 : index
    %44 = memref.load %arg1[%c5] : memref<17xf32, #tpu.memory_space<smem>>
    %45 = vector.broadcast %44 : f32 to vector<8x128xf32>
    %46 = arith.mulf %45, %3 : vector<8x128xf32>
    %47 = arith.addf %43, %46 : vector<8x128xf32>
    %cst_7 = arith.constant 0.000000e+00 : f32
    %48 = vector.broadcast %cst_7 : f32 to vector<8x128xf32>
    %49 = arith.maximumf %47, %48 : vector<8x128xf32>
    %c14 = arith.constant 14 : index
    %50 = memref.load %arg1[%c14] : memref<17xf32, #tpu.memory_space<smem>>
    %51 = vector.broadcast %50 : f32 to vector<8x128xf32>
    %52 = arith.mulf %51, %49 : vector<8x128xf32>
    %53 = arith.addf %37, %52 : vector<8x128xf32>
    %c11 = arith.constant 11 : index
    %54 = memref.load %arg1[%c11] : memref<17xf32, #tpu.memory_space<smem>>
    %55 = vector.broadcast %54 : f32 to vector<8x128xf32>
    %c6 = arith.constant 6 : index
    %56 = memref.load %arg1[%c6] : memref<17xf32, #tpu.memory_space<smem>>
    %57 = vector.broadcast %56 : f32 to vector<8x128xf32>
    %58 = arith.mulf %57, %1 : vector<8x128xf32>
    %59 = arith.addf %55, %58 : vector<8x128xf32>
    %c7 = arith.constant 7 : index
    %60 = memref.load %arg1[%c7] : memref<17xf32, #tpu.memory_space<smem>>
    %61 = vector.broadcast %60 : f32 to vector<8x128xf32>
    %62 = arith.mulf %61, %3 : vector<8x128xf32>
    %63 = arith.addf %59, %62 : vector<8x128xf32>
    %cst_8 = arith.constant 0.000000e+00 : f32
    %64 = vector.broadcast %cst_8 : f32 to vector<8x128xf32>
    %65 = arith.maximumf %63, %64 : vector<8x128xf32>
    %c15 = arith.constant 15 : index
    %66 = memref.load %arg1[%c15] : memref<17xf32, #tpu.memory_space<smem>>
    %67 = vector.broadcast %66 : f32 to vector<8x128xf32>
    %68 = arith.mulf %67, %65 : vector<8x128xf32>
    %69 = arith.addf %53, %68 : vector<8x128xf32>
    %cst_9 = arith.constant 5.000000e-01 : f32
    %70 = vector.broadcast %cst_9 : f32 to vector<8x128xf32>
    %71 = arith.mulf %70, %69 : vector<8x128xf32>
    %72 = math.tanh %71 : vector<8x128xf32>
    %cst_10 = arith.constant 5.000000e-01 : f32
    %73 = vector.broadcast %cst_10 : f32 to vector<8x128xf32>
    %74 = arith.mulf %73, %72 : vector<8x128xf32>
    %cst_11 = arith.constant 5.000000e-01 : f32
    %75 = vector.broadcast %cst_11 : f32 to vector<8x128xf32>
    %76 = arith.addf %74, %75 : vector<8x128xf32>
    %c0_12 = arith.constant 0 : index
    %c0_13 = arith.constant 0 : index
    %77 = vector.load %arg3[%c0_12, %c0_13] : memref<8x128xf32, #tpu.memory_space<vmem>>, vector<8x128xf32>
    tpu.vector_store %arg3[%c0_12, %c0_13], %76 {strides = array<i32>} : memref<8x128xf32, #tpu.memory_space<vmem>>, vector<8x128xf32>,
    return
  }
  func.func @transform_0(%arg0: i32) -> i32 {
    %c0_i32 = arith.constant 0 : i32
    %c0_i32_0 = arith.constant 0 : i32
    return %c0_i32 : i32
  }
  func.func @transform_1(%arg0: i32) -> (i32, i32, i32) {
    %c0_i32 = arith.constant 0 : i32
    %c0_i32_0 = arith.constant 0 : i32
    %c0_i32_1 = arith.constant 0 : i32
    return %c0_i32, %arg0, %c0_i32_0 : i32, i32, i32
  }
  func.func @transform_2(%arg0: i32) -> (i32, i32) {
    %c0_i32 = arith.constant 0 : i32
    %c0_i32_0 = arith.constant 0 : i32
    return %arg0, %c0_i32 : i32, i32
  }
}

</mosaic_0001>

<bundles_post_ra>
// kernel: tpu_custom_call.1
= control target key start
LH: loop header
LB: loop body
LE: loop exit
PB: predicated region body
PF: predicated region fallthrough
CT: control target
= control target key end

     0   :  { %7 = vsyncpa [#allocation5], 0  ;;  %s280_s0 = inlined_call_operand.hbm [shape: f32[17], index: 0, kind: input, shape index: {}]   ;;  %s281_s1 = inlined_call_operand.hbm [shape: f32[2,8,128], index: 1, kind: input, shape index: {}]   ;;  %s282_s2 = inlined_call_operand.hbm [shape: f32[8,128], index: 2, kind: output, shape index: {}]  }
   0x1   :  { %8 = vsyncpa [#allocation3], 0 }
   0x2   :  { %9 = vsyncpa [#allocation4], 0  ;;  %s146_s11 = scalar_lea.hbm %s280_s0, 16 }
   0x3   :  { %p147_p0 = scmp.ne.s32.totalorder %s280_s0, %s146_s11  ;;  %p150_p1 = scmp.lt.u32.totalorder %s146_s11, %s280_s0 }
   0x5   :  { %p152_p2 = pnand %p150_p1, %p147_p0 }
   0x7   :  { %155 = shalt.err (!%p152_p2)
}
   0x8   :  { %s206_s16 = smov [#allocation2]   ;;  %s207_s19 = smov [#allocation6]  }
   0x9   :  { %17 = dma.hbm_to_smem %s280_s0, 16, %s206_s16, [#allocation5]  }
   0xa   :  { %s23_s20 = sshll.u32 %s207_s19, 4  ;;  %s156_s23 = scalar_lea.hbm %s281_s1, 256  ;;  %s24_s20 = int_to_ptr.vmem [resolvable:$true] %s23_s20 }
   0xb   :  { %p157_p3 = scmp.ne.s32.totalorder %s281_s1, %s156_s23  ;;  %p160_p4 = scmp.lt.u32.totalorder %s156_s23, %s281_s1 }
   0xd   :  { %p162_p5 = pnand %p160_p4, %p157_p3 }
   0xf   :  { %165 = shalt.err (!%p162_p5)
}
  0x10   :  { %s166_s28 = scalar_lea.vmem %s24_s20, 256  ;;  %p171_p7 = scmp.lt.s32.totalorder %s24_s20, %s24_s20 }
  0x11   :  { %p167_p6 = scmp.ne.s32.totalorder %s24_s20, %s166_s28  ;;  %p172_p8 = scmp.lt.s32.totalorder %s166_s28, %s166_s28 }
  0x13   :  { %p173_p9 = por %p172_p8, %p171_p7 }
  0x15   :  { %p174_p10 = pnand %p173_p9, %p167_p6 }
  0x17   :  { %177 = shalt.err (!%p174_p10)
}
  0x18   :  { %s208_s0 = smov 128   ;;  %s209_s29 = smov 8  }
  0x19   :  { %29 = dma.hbm_to_vmem [thread:$0]  %s281_s1, 256, %s24_s20, [#allocation3], %s208_s0, %s208_s0, %s209_s29  }
  0x1a   :  { %200 = dma.done.wait [#allocation5], 16  }
  0x1b   :  { %201 = vsyncadd [#allocation5], 4294967280 }
  0x1c   :  { %202 = dma.done.wait [#allocation3], 256  }
  0x1d   :  { %203 = vsyncadd [#allocation3], 4294967040 }
  0x1e   :  { %36 = sfence }
  0x1f   :  { %s124_s4 = sld [smem:[#allocation2 + $0x8]]  ;;  %s125_s6 = sld [smem:[#allocation2 + $0x1]]  ;;  %v37_v0 = vld [vmem:[#allocation6] sm:$0xff]  ;;  %v39_v1 = vld [vmem:[#allocation6 + $0x8] sm:$0xff] }
  0x20   :  { %s44_s5 = sld [smem:[#allocation2]]  ;;  %s127_s8 = sld [smem:[#allocation2 + $0x9]] }
  0x21   :  { %s250_s7 = sld [smem:[#allocation2 + $0x10]]  ;;  %s128_s9 = sld [smem:[#allocation2 + $0x2]] }
  0x22   :  { %s129_s10 = sld [smem:[#allocation2 + $0x3]]  ;;  %s252_s11 = sld [smem:[#allocation2 + $0xc]] }
  0x23   :  { %s254_s12 = sld [smem:[#allocation2 + $0xa]]  ;;  %s132_s1 = sld [smem:[#allocation2 + $0x4]] }
  0x24   :  { %s133_s13 = sld [smem:[#allocation2 + $0x5]]  ;;  %s258_s15 = sld [smem:[#allocation2 + $0xb]] }
  0x25   :  { %s256_s14 = sld [smem:[#allocation2 + $0xd]]  ;;  %v43_v2 = vstv %s124_s4  ;;  %v49_v4 = vstv %s125_s6  ;;  %s136_s16 = sld [smem:[#allocation2 + $0x6]] }
  0x26   :  { %v45_v3 = vstv %s44_s5  ;;  %s137_s17 = sld [smem:[#allocation2 + $0x7]]  ;;  %v50_v6 = vmul.f32 %v49_v4, %v39_v1  ;;  %v58_v7 = vstv %s127_s8  ;;  %s260_s18 = sld [smem:[#allocation2 + $0xe]] }
  0x27   :  { %v46_v5 = vmul.f32 %v45_v3, %v37_v0  ;;  %v60_v8 = vstv %s128_s9  ;;  %s138_s19 = sld [smem:[#allocation2 + $0xf]]  ;;  %v41_v28 = vstv %s250_s7  ;;  %s210_s20 = smov [#allocation7]  }
  0x28   :  { %v64_v9 = vstv %s129_s10  ;;  %v61_v11 = vmul.f32 %v60_v8, %v37_v0  ;;  %v54_v20 = vstv %s252_s11  ;;  %s113_s21 = sshll.u32 %s210_s20, 4  ;;  %s114_s21 = int_to_ptr.vmem [resolvable:$true] %s113_s21 }
  0x29   :  { %v47_v10 = vadd.f32 %v46_v5, %v43_v2  ;;  %v65_v12 = vmul.f32 %v64_v9, %v39_v1  ;;  %v73_v13 = vstv %s254_s12  ;;  %v75_v14 = vstv %s132_s1  ;;  %s178_s22 = scalar_lea.vmem %s114_s21, 128  ;;  %p183_p12 = scmp.lt.s32.totalorder %s114_s21, %s114_s21 }
  0x2a   :  { %v79_v15 = vstv %s133_s13  ;;  %v62_v17 = vadd.f32 %v61_v11, %v58_v7  ;;  %v76_v18 = vmul.f32 %v75_v14, %v37_v0  ;;  %v88_v21 = vstv %s258_s15  ;;  %p179_p11 = scmp.ne.s32.totalorder %s114_s21, %s178_s22  ;;  %p184_p13 = scmp.lt.s32.totalorder %s178_s22, %s178_s22 }
  0x2b   :  { %v51_v16 = vadd.f32 %v50_v6, %v47_v10  ;;  %v80_v19 = vmul.f32 %v79_v15, %v39_v1  ;;  %v90_v22 = vstv %s136_s16  ;;  %v69_v29 = vstv %s256_s14 }
  0x2c   :  { %v94_v23 = vstv %s137_s17  ;;  %v66_v25 = vadd.f32 %v65_v12, %v62_v17  ;;  %v77_v26 = vadd.f32 %v76_v18, %v73_v13  ;;  %v91_v27 = vmul.f32 %v90_v22, %v37_v0  ;;  %p185_p0 = por %p184_p13, %p183_p12 }
  0x2d   :  { %v52_v24 = vmax.f32 %v51_v16, 0.0  ;;  %v95_v30 = vmul.f32 %v94_v23, %v39_v1  ;;  %v84_v35 = vstv %s260_s18  ;;  %v99_v40 = vstv %s138_s19 }
  0x2e   :  { %v67_v32 = vmax.f32 %v66_v25, 0.0  ;;  %v81_v33 = vadd.f32 %v80_v19, %v77_v26  ;;  %v92_v34 = vadd.f32 %v91_v27, %v88_v21  ;;  %p186_p1 = pnand %p185_p0, %p179_p11 }
  0x2f   :  { %v55_v31 = vmul.f32 %v54_v20, %v52_v24 }
  0x30   :  { %v70_v37 = vmul.f32 %v69_v29, %v67_v32  ;;  %v82_v38 = vmax.f32 %v81_v33, 0.0  ;;  %v96_v39 = vadd.f32 %v95_v30, %v92_v34 }
  0x31   :  { %v56_v36 = vadd.f32 %v55_v31, %v41_v28 }
  0x32   :  { %v85_v42 = vmul.f32 %v84_v35, %v82_v38  ;;  %v97_v43 = vmax.f32 %v96_v39, 0.0 }
  0x33   :  { %v71_v41 = vadd.f32 %v70_v37, %v56_v36 }
  0x34   :  { %v100_v45 = vmul.f32 %v99_v40, %v97_v43 }
  0x35   :  { %v86_v44 = vadd.f32 %v85_v42, %v71_v41 }
  0x37   :  { %v101_v46 = vadd.f32 %v100_v45, %v86_v44 }
  0x39   :  { %v102_v47 = vmul.f32 0.5, %v101_v46 }
  0x3b   :  { %144 = vtanh.f32 %v102_v47 }
  0x45   :  { %v145_v48 = vpop.eup %144 }
  0x46   :  { %v104_v49 = vmul.f32 0.5, %v145_v48 }
  0x48   :  { %v105_v50 = vadd.f32 0.5, %v104_v49 }
  0x4a   :  { %106 = vst [vmem:[#allocation7] sm:$0xff] %v105_v50 }
  0x4b   :  { %189 = shalt.err (!%p186_p1)
}
  0x4c   :  { %s190_s25 = scalar_lea.hbm %s282_s2, 128 }
  0x4d   :  { %p191_p2 = scmp.ne.s32.totalorder %s282_s2, %s190_s25  ;;  %p194_p3 = scmp.lt.u32.totalorder %s190_s25, %s282_s2 }
  0x4f   :  { %p196_p4 = pnand %p194_p3, %p191_p2 }
  0x51   :  { %199 = shalt.err (!%p196_p4)
}
  0x52   :  { %116 = dma.vmem_to_hbm [thread:$0]  %s114_s21, 128, %s282_s2, [#allocation4]  }
  0x53   :  { %204 = dma.done.wait [#allocation4], 128  }
  0x54   :  { %205 = vsyncadd [#allocation4], 4294967168 }
  0x55   :  { %120 = vsyncpa [#allocation3], 1 }
  0x56   :  { %121 = vsyncpa [#allocation4], 1 }
  0x57   :  { %122 = vsyncpa [#allocation5], 1 }

</bundles_post_ra>
